<compile_context>
chip_gen: v5e
topology: v5e:2x2
jax: 0.10.0
libtpu: 0.0.40
codegen_flags: <defaults>
</compile_context>

<pallas_src>
import functools
import math

import jax
import jax.numpy as jnp
from jax import lax
from jax.experimental import pallas as pl
from jax.experimental.pallas import tpu as pltpu


# --------------------------------------------------------------------------- stage 1
def _masep_inv_kernel(ins_ref, inv_ref, *, freq, denom):
    """inv_ref[b, 0] = divide_no_nan(1, mean(|x[:, freq:] - x[:, :-freq]|, axis=1))."""
    x = ins_ref[...].astype(jnp.float32)
    ti = x.shape[1]
    diff = jnp.abs(x[:, freq:] - x[:, : ti - freq])
    masep = jnp.sum(diff, axis=1, keepdims=True) / jnp.float32(denom)       # (bb, 1)
    inv = jnp.float32(1.0) / masep
    # divide_no_nan semantics: masep==0 -> inf -> 0; overflow to inf -> 0; NaN -> 0.
    inv_ref[...] = jnp.where(jnp.isfinite(inv), inv, jnp.float32(0.0))


# --------------------------------------------------------------------------- stage 2
def _mase_reduce_kernel(f_ref, t_ref, m_ref, w_ref, out_ref, acc_ref, *, n_chunks, acc_w):
    ti = pl.program_id(1)

    @pl.when(ti == 0)
    def _():
        acc_ref[...] = jnp.zeros_like(acc_ref)

    # Hoisted once per grid step (JAX does not CSE broadcast_in_dim inside the loop).
    wb = jnp.broadcast_to(w_ref[...], (acc_ref.shape[0], acc_w))            # (block_b, acc_w)

    def chunk(start, acc):
        f = f_ref[:, pl.ds(start, acc_w)].astype(jnp.float32)
        y = t_ref[:, pl.ds(start, acc_w)].astype(jnp.float32)
        m = m_ref[:, pl.ds(start, acc_w)].astype(jnp.float32)               # bool/int8/f32 mask
        return acc + jnp.abs(y - f) * (m * wb)

    acc = acc_ref[...]
    if n_chunks <= 8:
        for k in range(n_chunks):                                           # static, fully unrolled
            acc = chunk(k * acc_w, acc)
    else:
        acc = lax.fori_loop(
            0, n_chunks,
            lambda k, a: chunk(pl.multiple_of(k * acc_w, acc_w), a),
            acc, unroll=4)
    acc_ref[...] = acc

    @pl.when(ti == pl.num_programs(1) - 1)
    def _():
        out_ref[0, 0] = jnp.sum(acc_ref[...])                               # one cross-lane reduce / block


def _pick_blocks(Bp, Tp, sub_align, target_bytes=4 << 20):
    """block_b: multiple of sub_align dividing Bp (or Bp), capped so >=2 batch blocks remain when
    the batch allows it; block_t: multiple of 128 dividing Tp (or Tp), with the f32 tile close to
    ~target_bytes per input stream."""
    if Bp % sub_align == 0:
        bb = sub_align
        while (Bp % (bb * 2) == 0 and (bb * 2) * 2 <= Bp
               and bb * Tp * 4 < target_bytes):
            bb *= 2
    else:
        bb = Bp
    if Tp % 128 == 0:
        max_elems = max(128, target_bytes // (4 * bb))
        bt = min(Tp, (max_elems // 128) * 128)
        while bt >= 128 and Tp % bt != 0:
            bt -= 128
        if bt < 128:
            bt = Tp
    else:
        bt = Tp
    return bb, bt


def mase_loss(insample, freq, forecast, target, mask, *, block_b=None, block_t=None):
    """MASE loss matching the PyTorch module's forward (mask may be f32 / bool / int8)."""
    B, T = forecast.shape
    assert target.shape == (B, T) and mask.shape == (B, T)
    assert insample.ndim == 2 and insample.shape[0] == B
    Ti = insample.shape[1]
    freq = int(freq)
    assert 0 < freq < Ti, "need 0 < freq < insample time length"

    # ---- stage 1: per-series safe inverse seasonal-naive scale (single insample stream) -----
    bb1 = 8 if B % 8 == 0 else B
    if B % 8 == 0:
        while B % (bb1 * 2) == 0 and bb1 * 2 * Ti * 4 <= (2 << 20):
            bb1 *= 2
    inv_w = pl.pallas_call(
        functools.partial(_masep_inv_kernel, freq=freq, denom=Ti - freq),
        out_shape=jax.ShapeDtypeStruct((B, 1), jnp.float32),
        grid_spec=pltpu.PrefetchScalarGridSpec(
            num_scalar_prefetch=0,
            grid=(B // bb1,),
            in_specs=[pl.BlockSpec((bb1, Ti), lambda i: (i, 0))],
            out_specs=pl.BlockSpec((bb1, 1), lambda i: (i, 0)),
        ),
        compiler_params=pltpu.CompilerParams(dimension_semantics=("parallel",)),
    )(insample)

    # ---- stage 2: masked, weighted |error| reduction ----------------------------------------
    min_itemsize = min(forecast.dtype.itemsize, target.dtype.itemsize, mask.dtype.itemsize)
    sub_align = 8 * max(1, 4 // min(min_itemsize, 4))   # 8 (f32) / 16 (bf16) / 32 (int8)

    # Small-batch sublane densification: (B, T) -> (B*rep, T//rep); each new row stays inside a
    # single series, so the per-series weight is simply repeated.
    rep = 1
    if block_b is None and block_t is None and B % sub_align != 0:
        cand = sub_align // math.gcd(B, sub_align)
        if T % cand == 0:
            rep = cand
    Bp, Tp = B * rep, T // rep
    if rep > 1:
        forecast = forecast.reshape(Bp, Tp)
        target = target.reshape(Bp, Tp)
        mask = mask.reshape(Bp, Tp)
        inv_w = jnp.repeat(inv_w, rep, axis=0)

    if block_b is None or block_t is None:
        auto_bb, auto_bt = _pick_blocks(Bp, Tp, sub_align)
        block_b = auto_bb if block_b is None else block_b
        block_t = auto_bt if block_t is None else block_t
    assert Bp % block_b == 0 and (block_b == Bp or block_b % sub_align == 0)
    assert Tp % block_t == 0 and (block_t == Tp or block_t % 128 == 0)
    n_bb, n_tt = Bp // block_b, Tp // block_t

    # Lane-aligned accumulator width; long chunk loops are handled by fori_loop in the kernel.
    acc_w = block_t
    for cand in (512, 256, 128):
        if block_t % cand == 0:
            acc_w = cand
            break
    n_chunks = block_t // acc_w

    # When the batch collapses to one block, split the time range into 2 parallel outer chunks so
    # both TensorCores on v7x stay busy (each gets its own partial-output slot).
    n_par = 2 if (n_bb == 1 and n_tt >= 2 and n_tt % 2 == 0) else 1
    n_tt_in = n_tt // n_par
    n_out = n_bb * n_par

    def big_map(g, ti):
        return (g // n_par, (g % n_par) * n_tt_in + ti)

    def w_map(g, ti):
        return (g // n_par, 0)

    def out_map(g, ti):
        return (g, 0)

    tile_in_bytes = block_b * block_t * (forecast.dtype.itemsize
                                         + target.dtype.itemsize
                                         + mask.dtype.itemsize)
    need = 2 * tile_in_bytes + block_b * acc_w * 4 + (1 << 20)
    vmem_limit = int(min(56 << 20, max(32 << 20, need + (8 << 20))))

    kernel = functools.partial(_mase_reduce_kernel, n_chunks=n_chunks, acc_w=acc_w)
    partials = pl.pallas_call(
        kernel,
        out_shape=jax.ShapeDtypeStruct((n_out, 1), jnp.float32),
        grid_spec=pltpu.PrefetchScalarGridSpec(
            num_scalar_prefetch=0,
            grid=(n_out, n_tt_in),                                   # reduction (time) axis last
            in_specs=[
                pl.BlockSpec((block_b, block_t), big_map),
                pl.BlockSpec((block_b, block_t), big_map),
                pl.BlockSpec((block_b, block_t), big_map),
                pl.BlockSpec((block_b, 1), w_map),
            ],
            out_specs=pl.BlockSpec((1, 1), out_map, memory_space=pltpu.SMEM),
            scratch_shapes=[pltpu.VMEM((block_b, acc_w), jnp.float32)],
        ),
        compiler_params=pltpu.CompilerParams(
            dimension_semantics=("parallel", "arbitrary"),
            vmem_limit_bytes=vmem_limit,
        ),
    )(forecast, target, mask, inv_w)

    return jnp.sum(partials) / jnp.float32(B * T)


def _reference(insample, freq, forecast, target, mask):
    masep = jnp.mean(jnp.abs(insample[:, freq:] - insample[:, :-freq]), axis=1)
    r = mask.astype(jnp.float32) / masep[:, None]
    r = jnp.where(jnp.isnan(r) | (r == jnp.inf), 0.0, r)
    return jnp.mean(jnp.abs(target - forecast).astype(jnp.float32) * r)


if __name__ == "__main__":
    key = jax.random.PRNGKey(0)
    ks = jax.random.split(key, 12)

    # Test 1: module-parity small shapes, auto tiling; one series has constant insample so
    # masep == 0 exercises the divide_no_nan path.
    B, Ti, T, freq = 2, 32, 256, 1
    insample = jax.random.normal(ks[0], (B, Ti), dtype=jnp.float32)
    insample = insample.at[0, :].set(1.0)                       # masep[0] == 0
    forecast = jax.random.normal(ks[1], (B, T), dtype=jnp.float32)
    target = jax.random.normal(ks[2], (B, T), dtype=jnp.float32)
    mask = (jax.random.uniform(ks[3], (B, T)) > 0.2).astype(jnp.float32)

    loss = jax.block_until_ready(mase_loss(insample, freq, forecast, target, mask))
    ref = _reference(insample, freq, forecast, target, mask)
    assert jnp.allclose(loss, ref, rtol=1e-5, atol=1e-5), (loss, ref)

    # Test 2: multi-block grid (parallel batch axis + multi-step time reduction), int8 mask.
    B2, Ti2, T2, freq2 = 64, 48, 512, 2
    insample2 = jax.random.normal(ks[4], (B2, Ti2), dtype=jnp.float32)
    forecast2 = jax.random.normal(ks[5], (B2, T2), dtype=jnp.float32)
    target2 = jax.random.normal(ks[6], (B2, T2), dtype=jnp.float32)
    mask2 = (jax.random.uniform(ks[7], (B2, T2)) > 0.2).astype(jnp.int8)

    loss2 = jax.block_until_ready(
        mase_loss(insample2, freq2, forecast2, target2, mask2, block_b=32, block_t=128))
    ref2 = _reference(insample2, freq2, forecast2, target2, mask2)
    assert jnp.allclose(loss2, ref2, rtol=1e-5, atol=1e-5), (loss2, ref2)

    # Test 3: single batch block -> parallel time split (n_par == 2 path, 2-TC coverage on v7x).
    B3, Ti3, T3, freq3 = 8, 24, 512, 1
    insample3 = jax.random.normal(ks[8], (B3, Ti3), dtype=jnp.float32)
    forecast3 = jax.random.normal(ks[9], (B3, T3), dtype=jnp.float32)
    target3 = jax.random.normal(ks[10], (B3, T3), dtype=jnp.float32)
    mask3 = (jax.random.uniform(ks[11], (B3, T3)) > 0.2).astype(jnp.float32)

    loss3 = jax.block_until_ready(
        mase_loss(insample3, freq3, forecast3, target3, mask3, block_t=128))
    ref3 = _reference(insample3, freq3, forecast3, target3, mask3)
    assert jnp.allclose(loss3, ref3, rtol=1e-5, atol=1e-5), (loss3, ref3)

    print("KERNEL_OK")
</pallas_src>

<mosaic_0001>
module attributes {stable_mosaic.version = 11 : i64} {
  func.func @_masep_inv_kernel(%arg0: i32, %arg1: memref<2x32xf32, #tpu.memory_space<vmem>>, %arg2: memref<2x1xf32, #tpu.memory_space<vmem>>) attributes {dimension_semantics = [#tpu.dimension_semantics<parallel>], iteration_bounds = array<i64: 1>, scalar_prefetch = 0 : i64, scratch_operands = 0 : i64, tpu.core_type = #tpu.core_type<tc>, window_params = [{transform_indices = @transform_0, window_bounds = array<i64: 2, 32>}, {transform_indices = @transform_1, window_bounds = array<i64: 2, 1>}]} {
    %c0 = arith.constant 0 : index
    %c0_0 = arith.constant 0 : index
    %0 = vector.load %arg1[%c0, %c0_0] : memref<2x32xf32, #tpu.memory_space<vmem>>, vector<2x32xf32>
    %1 = vector.extract_strided_slice %0 {offsets = [0, 1], sizes = [2, 31], strides = [1, 1]} : vector<2x32xf32> to vector<2x31xf32>
    %2 = vector.extract_strided_slice %0 {offsets = [0, 0], sizes = [2, 31], strides = [1, 1]} : vector<2x32xf32> to vector<2x31xf32>
    %3 = arith.subf %1, %2 : vector<2x31xf32>
    %4 = math.absf %3 : vector<2x31xf32>
    %cst = arith.constant dense<0.000000e+00> : vector<2xf32>
    %5 = vector.multi_reduction <add>, %4, %cst [1] : vector<2x31xf32> to vector<2xf32>
    %6 = vector.shape_cast %5 : vector<2xf32> to vector<2x1xf32>
    %cst_1 = arith.constant 3.100000e+01 : f32
    %7 = vector.broadcast %cst_1 : f32 to vector<2x1xf32>
    %8 = arith.divf %6, %7 : vector<2x1xf32>
    %cst_2 = arith.constant 1.000000e+00 : f32
    %9 = vector.broadcast %cst_2 : f32 to vector<2x1xf32>
    %10 = arith.divf %9, %8 : vector<2x1xf32>
    %11 = tpu.weird %10 : vector<2x1xf32> -> vector<2x1xi1>
    %cst_3 = arith.constant dense<true> : vector<2x1xi1>
    %12 = arith.xori %11, %cst_3 : vector<2x1xi1>
    %cst_4 = arith.constant 0.000000e+00 : f32
    %13 = vector.broadcast %cst_4 : f32 to vector<2x1xf32>
    %14 = arith.select %12, %10, %13 : vector<2x1xi1>, vector<2x1xf32>
    %c0_5 = arith.constant 0 : index
    %c0_6 = arith.constant 0 : index
    %15 = vector.load %arg2[%c0_5, %c0_6] : memref<2x1xf32, #tpu.memory_space<vmem>>, vector<2x1xf32>
    tpu.vector_store %arg2[%c0_5, %c0_6], %14 {strides = array<i32>} : memref<2x1xf32, #tpu.memory_space<vmem>>, vector<2x1xf32>,
    return
  }
  func.func @transform_0(%arg0: i32) -> (i32, i32) {
    %c0_i32 = arith.constant 0 : i32
    %c0_i32_0 = arith.constant 0 : i32
    return %arg0, %c0_i32 : i32, i32
  }
  func.func @transform_1(%arg0: i32) -> (i32, i32) {
    %c0_i32 = arith.constant 0 : i32
    %c0_i32_0 = arith.constant 0 : i32
    return %arg0, %c0_i32 : i32, i32
  }
}

</mosaic_0001>

<bundles_post_ra>
// kernel: tpu_custom_call.1
= control target key start
LH: loop header
LB: loop body
LE: loop exit
PB: predicated region body
PF: predicated region fallthrough
CT: control target
= control target key end

     0   :  { %6 = vsyncpa [#allocation3], 0  ;;  %s105_s9 = smov [#allocation2]   ;;  %s126_s0 = inlined_call_operand.hbm [shape: f32[2,32], index: 0, kind: input, shape index: {}]   ;;  %s127_s1 = inlined_call_operand.vmem [shape: f32[2,1], index: 1, kind: output, shape index: {}]  }
   0x1   :  { %s12_s8 = sshll.u32 %s126_s0, 4  ;;  %s14_s10 = sshll.u32 %s105_s9, 4  ;;  %s13_s8 = int_to_ptr.hbm [resolvable:$true] %s12_s8  ;;  %s15_s10 = int_to_ptr.vmem [resolvable:$true] %s14_s10 }
   0x2   :  { %17 = dma.hbm_to_vmem [thread:$0]  %s13_s8, 32, %s15_s10, [#allocation3]  }
   0x3   :  { %103 = dma.done.wait [#allocation3], 32  }
   0x4   :  { %104 = vsyncadd [#allocation3], 4294967264  ;;  %v22_v0 = vld [vmem:[#allocation2] sm:$0x3]  ;;  %s106_s11 = smov 1   ;;  %s107_s12 = smov 127  }
   0x5   :  { %24 = vrot.lane.b32.xlu0 %v22_v0, %s106_s11  ;;  %vm33_vm0 = vcmask 246784   ;;  %v108_v6 = vmov 31.0   ;;  %vm63_vm6 = vcmask 1024   ;;  %vm109_vm8 = vmmov 1  }
   0x6   :  { %75 = vrcp.f32 %v108_v6 }
   0xc   :  { %v76_v7 = vpop.eup %75 }
   0xd   :  { %v38_v8 = vmul.f32 31.0, %v76_v7  ;;  %vm42_vm1 = vweird.f32 %v76_v7 }
   0xf   :  { %v39_v9 = vsub.f32 1.0, %v38_v8 }
  0x11   :  { %v40_v10 = vmul.f32 %v76_v7, %v39_v9 }
  0x13   :  { %v41_v11 = vadd.f32 %v76_v7, %v40_v10 }
  0x15   :  { %v43_v12 = vsel %vm42_vm1, %v76_v7, %v41_v11 }
  0x77   :  { %v25_v1 = vpop.permute.xlu0 %24 }
  0x78   :  { %v27_v2 = vsub.f32 %v22_v0, %v25_v1 }
  0x7a   :  { %v28_v3 = vand.u32 2147483647, %v27_v2 }
  0x7c   :  { %30 = vrot.lane.b32.xlu0 %v28_v3, %s107_s12 }
  0xee   :  { %v31_v4 = vpop.permute.xlu0 %30 }
  0xef   :  { %v34_v5 = vsel %vm33_vm0, %v31_v4, 0.0 }
  0xf0   :  { %35 = vadd.xlane.f32.xlu1 %v34_v5 }
 0x163   :  { %v36_v13 = vpop.xlane.xlu1 %35 }
 0x164   :  { %v44_v14 = vmul.f32 %v43_v12, %v36_v13 }
 0x166   :  { %77 = vrcp.f32 %v44_v14  ;;  %v56_v18 = vand.u32 2147483648, %v44_v14  ;;  %v54_v20 = vand.u32 2147483647, %v44_v14  ;;  %vm50_vm3 = vweird.f32 %v44_v14 }
 0x168   :  { %v57_v22 = vor.u32 1.1754944e-38, %v56_v18  ;;  %vm55_vm5 = vcmp.eq.f32.partialorder %v54_v20, 8.507059e+37 }
 0x16c   :  { %v78_v15 = vpop.eup %77 }
 0x16d   :  { %v46_v16 = vmul.f32 %v78_v15, %v44_v14  ;;  %vm51_vm2 = vweird.f32 %v78_v15 }
 0x16e   :  { %vm52_vm4 = vmor %vm50_vm3, %vm51_vm2 }
 0x16f   :  { %v47_v17 = vsub.f32 1.0, %v46_v16 }
 0x171   :  { %v48_v19 = vmul.f32 %v78_v15, %v47_v17 }
 0x173   :  { %v49_v21 = vadd.f32 %v78_v15, %v48_v19 }
 0x175   :  { %v53_v23 = vsel %vm52_vm4, %v78_v15, %v49_v21 }
 0x176   :  { %v58_v24 = vsel %vm55_vm5, %v57_v22, %v53_v23 }
 0x177   :  { %vm60_vm7 = vweird.f32 %v58_v24 }
 0x178   :  { %vm61_vm9 = vmxor %vm60_vm7, %vm109_vm8 }
 0x179   :  { %v62_v25 = vsel %vm61_vm9, %v58_v24, 0.0 }
 0x17a   :  { %64 = vst.msk [vmem:[%s127_s1] sm:$0x3] %vm63_vm6, %v62_v25 }
 0x17b   :  { %69 = vsyncpa [#allocation3], 1 }

</bundles_post_ra>
